<compile_context>
chip_gen: v7x
topology: tpu7x:2x2x1
jax: 0.10.0
libtpu: 0.0.40
codegen_flags: <defaults>
</compile_context>

<pallas_src>
import jax
import jax.numpy as jnp
from jax.experimental import pallas as pl
from jax.experimental.pallas import tpu as pltpu


def fused_affine_kernel(x_ref, w_ref, b_ref, o_ref):
    """One batch tile: o = x @ W_total + b_total (single MXU pass, f32 accumulate)."""
    acc = jnp.dot(x_ref[...], w_ref[...], preferred_element_type=jnp.float32)
    o_ref[...] = (acc + b_ref[...].astype(jnp.float32)).astype(o_ref.dtype)


def fold_linear_chain(params, compute_dtype=None):
    """Fold a chain of Linear layers (no activations) into one affine map.

    Call ONCE at parameter-load time (hoisted out of the forward).

    params: list of (W, b) with W shape (in, out), b shape (1, out)
            (PyTorch weight transposed so the map is x @ W + b).
    Returns (W_total, b_total) of shapes (in0, outN), (1, outN).
    Only cast W to compute_dtype (e.g. bf16) if the activations arrive in that
    dtype natively; casting x in the wrapper would cost more than it saves.
    """
    w_total, b_total = params[0]
    for w, b in params[1:]:
        w_total = w_total @ w
        b_total = b_total @ w + b
    if compute_dtype is not None:
        w_total = w_total.astype(compute_dtype)
    return w_total, b_total


def _select_block_batch(B, requested, dtype):
    """Pick a sublane-aligned batch tile."""
    sub = 16 if dtype == jnp.bfloat16 else 8
    bb = 2048 if requested is None else requested   # large default: amortize grid overhead
    if B >= 2 * sub:
        # v7x: guarantee >=2 grid steps so the "parallel" axis can use both TensorCores.
        bb = min(bb, pl.cdiv(B, 2))
    bb = min(bb, 4096)                               # v5e scoped-VMEM safety cap
    bb = min(bb, B)
    if bb < B:
        bb = max(sub, (bb // sub) * sub)             # sublane-aligned interior tiles
    return bb


def my_custom_nas_model_forward(x, w_total, b_total, *, block_batch=None):
    """Forward pass: single fused affine map per batch tile.

    x:        (batch, input_size) activations.
    w_total:  (input_size, output_size) pre-folded weight (fold_linear_chain).
    b_total:  (1, output_size) pre-folded bias.
    """
    B, in_dim = x.shape
    out_dim = w_total.shape[1]
    out_dtype = x.dtype

    bb = _select_block_batch(B, block_batch, x.dtype)
    grid = (pl.cdiv(B, bb),)

    itemsize = jnp.dtype(out_dtype).itemsize
    cost = pl.CostEstimate(
        flops=2 * B * in_dim * out_dim,
        transcendentals=0,
        bytes_accessed=(B * in_dim + in_dim * out_dim + out_dim + B * out_dim) * itemsize,
    )

    return pl.pallas_call(
        fused_affine_kernel,
        out_shape=jax.ShapeDtypeStruct((B, out_dim), out_dtype),
        grid=grid,
        in_specs=[
            pl.BlockSpec((bb, in_dim), lambda i: (i, 0)),        # x: tiled on batch
            pl.BlockSpec((in_dim, out_dim), lambda i: (0, 0)),   # W_total: VMEM-resident
            pl.BlockSpec((1, out_dim), lambda i: (0, 0)),        # b_total: VMEM-resident
        ],
        out_specs=pl.BlockSpec((bb, out_dim), lambda i: (i, 0)), # unpadded (B, out_dim)
        compiler_params=pltpu.CompilerParams(
            dimension_semantics=("parallel",),
        ),
        cost_estimate=cost,
    )(x, w_total, b_total)


def init_linear_params(key, layer_dims):
    """Deterministic synthetic init mimicking nn.Linear shapes.

    PyTorch stores weight as (out, in) and computes x @ W.T + b; we store the
    transpose (in, out) so the kernel computes x @ W + b.
    """
    params = []
    for fan_in, fan_out in zip(layer_dims[:-1], layer_dims[1:]):
        key, wk, bk = jax.random.split(key, 3)
        bound = 1.0 / jnp.sqrt(jnp.float32(fan_in))
        w = jax.random.uniform(wk, (fan_in, fan_out), jnp.float32, -bound, bound)
        b = jax.random.uniform(bk, (1, fan_out), jnp.float32, -bound, bound)
        params.append((w, b))
    return params


def _reference(x, params):
    """Pure-JAX reference: the original layer-by-layer Linear chain."""
    out = x
    for w, b in params:
        out = out @ w + b
    return out


if __name__ == "__main__":
    # Module config: input_size=(32,), output_size=(8,), l1..l4 in [32, 64]
    input_size = 32
    output_size = 8
    l1, l2, l3, l4 = 64, 48, 64, 32

    key = jax.random.PRNGKey(0)
    layer_dims = [input_size, l1, l2, l3, l4, output_size]
    key, pk = jax.random.split(key)
    params = init_linear_params(pk, layer_dims)

    # One-time fold at parameter-load time (hoisted out of the forward).
    w_total, b_total = fold_linear_chain(params)

    # --- test 1: small batch, single grid step -------------------------------
    key, xk = jax.random.split(key)
    x_small = jax.random.normal(xk, (8, input_size), jnp.float32)
    y_small = jax.block_until_ready(
        my_custom_nas_model_forward(x_small, w_total, b_total))
    ref_small = _reference(x_small, params)
    assert y_small.shape == (8, output_size), f"bad shape {y_small.shape}"
    assert jnp.allclose(y_small, ref_small, atol=1e-4, rtol=1e-4), \
        "mismatch vs JAX reference (small batch)"

    # --- test 2: batch not a multiple of the block size (ragged last tile) ---
    key, xk2 = jax.random.split(key)
    x_ragged = jax.random.normal(xk2, (20, input_size), jnp.float32)
    y_ragged = jax.block_until_ready(
        my_custom_nas_model_forward(x_ragged, w_total, b_total))
    ref_ragged = _reference(x_ragged, params)
    assert y_ragged.shape == (20, output_size), f"bad shape {y_ragged.shape}"
    assert jnp.allclose(y_ragged, ref_ragged, atol=1e-4, rtol=1e-4), \
        "mismatch vs JAX reference (ragged batch)"

    print("KERNEL_OK")
</pallas_src>

<mosaic_0001>
module attributes {stable_mosaic.version = 11 : i64} {
  func.func @fused_affine_kernel(%arg0: i32, %arg1: memref<8x32xf32, #tpu.memory_space<vmem>>, %arg2: memref<32x8xf32, #tpu.memory_space<vmem>>, %arg3: memref<1x8xf32, #tpu.memory_space<vmem>>, %arg4: memref<8x8xf32, #tpu.memory_space<vmem>>) attributes {dimension_semantics = [#tpu.dimension_semantics<parallel>], iteration_bounds = array<i64: 1>, scalar_prefetch = 0 : i64, scratch_operands = 0 : i64, tpu.core_type = #tpu.core_type<tc>, window_params = [{transform_indices = @transform_0, window_bounds = array<i64: 8, 32>}, {pipeline_mode = #tpu.pipeline_mode<synchronous>, transform_indices = @transform_1, window_bounds = array<i64: 32, 8>}, {pipeline_mode = #tpu.pipeline_mode<synchronous>, transform_indices = @transform_2, window_bounds = array<i64: 1, 8>}, {transform_indices = @transform_3, window_bounds = array<i64: 8, 8>}]} {
    %c0 = arith.constant 0 : index
    %c0_0 = arith.constant 0 : index
    %0 = vector.load %arg1[%c0, %c0_0] : memref<8x32xf32, #tpu.memory_space<vmem>>, vector<8x32xf32>
    %c0_1 = arith.constant 0 : index
    %c0_2 = arith.constant 0 : index
    %1 = vector.load %arg2[%c0_1, %c0_2] : memref<32x8xf32, #tpu.memory_space<vmem>>, vector<32x8xf32>
    %cst = arith.constant dense<0.000000e+00> : vector<8x8xf32>
    %2 = tpu.matmul %0, %1, %cst {dimension_numbers = #tpu.dot_dimension_numbers<[1], [0], [0], [1], [0, 0, 1, 1], [], []>} : vector<8x32xf32>, vector<32x8xf32>, vector<8x8xf32> -> vector<8x8xf32>
    %c0_3 = arith.constant 0 : index
    %c0_4 = arith.constant 0 : index
    %3 = vector.load %arg3[%c0_3, %c0_4] : memref<1x8xf32, #tpu.memory_space<vmem>>, vector<1x8xf32>
    %4 = vector.broadcast %3 : vector<1x8xf32> to vector<8x8xf32>
    %5 = arith.addf %2, %4 : vector<8x8xf32>
    %c0_5 = arith.constant 0 : index
    %c0_6 = arith.constant 0 : index
    %6 = vector.load %arg4[%c0_5, %c0_6] : memref<8x8xf32, #tpu.memory_space<vmem>>, vector<8x8xf32>
    tpu.vector_store %arg4[%c0_5, %c0_6], %5 {strides = array<i32>} : memref<8x8xf32, #tpu.memory_space<vmem>>, vector<8x8xf32>,
    return
  }
  func.func @transform_0(%arg0: i32) -> (i32, i32) {
    %c0_i32 = arith.constant 0 : i32
    %c0_i32_0 = arith.constant 0 : i32
    return %arg0, %c0_i32 : i32, i32
  }
  func.func @transform_1(%arg0: i32) -> (i32, i32) {
    %c0_i32 = arith.constant 0 : i32
    %c0_i32_0 = arith.constant 0 : i32
    %c0_i32_1 = arith.constant 0 : i32
    return %c0_i32, %c0_i32_0 : i32, i32
  }
  func.func @transform_2(%arg0: i32) -> (i32, i32) {
    %c0_i32 = arith.constant 0 : i32
    %c0_i32_0 = arith.constant 0 : i32
    %c0_i32_1 = arith.constant 0 : i32
    return %c0_i32, %c0_i32_0 : i32, i32
  }
  func.func @transform_3(%arg0: i32) -> (i32, i32) {
    %c0_i32 = arith.constant 0 : i32
    %c0_i32_0 = arith.constant 0 : i32
    return %arg0, %c0_i32 : i32, i32
  }
}

</mosaic_0001>

<bundles_post_ra>
// kernel: tpu_custom_call.1
= control target key start
LH: loop header
LB: loop body
LE: loop exit
PB: predicated region body
PF: predicated region fallthrough
CT: control target
= control target key end

     0   :  { %v169_v3 = vmov 0.0|0.0   ;;  %vm170_vm0 = vmmov 0   ;;  %v171_v6 = vmov 0.0   ;;  %s223_s0 = inlined_call_operand.vmem [shape: f32[8,32], index: 0, kind: input, shape index: {}]   ;;  %s224_s1 = inlined_call_operand.vmem [shape: f32[32,8], index: 1, kind: input, shape index: {}]   ;;  %s225_s2 = inlined_call_operand.vmem [shape: f32[1,8], index: 2, kind: input, shape index: {}]   ;;  %s226_s3 = inlined_call_operand.hbm [shape: f32[8,8], index: 3, kind: output, shape index: {}]  }
   0x1   :  { %v16_v0 = vld [vmem:[%s224_s1] sm:$0xff]  ;;  %v17_v1 = vld [vmem:[%s224_s1 + $0x8] sm:$0xff]  ;;  %v18_v2 = vld [vmem:[%s224_s1 + $0x10] sm:$0xff]  ;;  %135 = vmatprep.subr.bf16.mxu0 %v169_v3  ;;  %132 = vmatprep.mubr.msk.f32.mxu0 %vm170_vm0, %v171_v6 }
   0x2   :  { %v136_v4 = vpack.c.bf16 %v17_v1, %v16_v0  ;;  %v19_v5 = vld [vmem:[%s224_s1 + $0x18] sm:$0xff] }
   0x3   :  { %8 = vsyncpa [#allocation3], 0  ;;  %v139_v7 = vpack.c.bf16 %v19_v5, %v18_v2  ;;  %v15_v8 = vld [vmem:[%s223_s0] sm:$0xff]  ;;  %vm27_vm1 = vcmask 261120   ;;  %s172_s24 = smov [#allocation2]   ;;  %vm101_vm2 = vcmask 64512  }
   0x4   :  { %137 = vmatpush3.bf16.msra.mxu0 %v136_v4  ;;  %v117_v9 = vld [vmem:[%s225_s2] ss:$0 sm:$0xff]  ;;  %s109_s1 = sshll.u32 %s172_s24, 4  ;;  %s110_s1 = int_to_ptr.vmem [resolvable:$true] %s109_s1 }
   0x5   :  { %138 = vmatprep.subr.bf16.mxu0 %v169_v3  ;;  %s145_s25 = scalar_lea.vmem %s110_s1, 128  ;;  %p150_p1 = scmp.lt.s32.totalorder %s110_s1, %s110_s1 }
   0x6   :  { %p146_p0 = scmp.ne.s32.totalorder %s110_s1, %s145_s25  ;;  %p151_p2 = scmp.lt.s32.totalorder %s145_s25, %s145_s25 }
   0x8   :  { %140 = vmatpush3.bf16.msra.mxu0 %v139_v7  ;;  %p152_p3 = por %p151_p2, %p150_p1 }
   0xa   :  { %p153_p4 = pnand %p152_p3, %p146_p0 }
   0xb   :  { %133 = vmatmul.mubr.msk.f32.vlgmr.msra.gmra.mrb[0].mxu0 %vm27_vm1, %v15_v8 }
  0xde   :  { %v97_v10 = vpop.f32.mrb[0].mxu0 }
  0xdf   :  { %v98_v11 = vadd.f32 %v117_v9, %v97_v10  ;;  %v134_v12 = vpop.f32.mrb[1].mxu0 }
  0xe1   :  { %102 = vst.msk [vmem:[#allocation2] sm:$0xff] %vm101_vm2, %v98_v11 }
  0xe2   :  { %156 = shalt.err (!%p153_p4)
}
  0xe3   :  { %s157_s27 = scalar_lea.hbm %s226_s3, 128 }
  0xe4   :  { %p158_p5 = scmp.ne.s32.totalorder %s226_s3, %s157_s27  ;;  %p161_p6 = scmp.lt.u32.totalorder %s157_s27, %s226_s3 }
  0xe6   :  { %p163_p7 = pnand %p161_p6, %p158_p5 }
  0xe8   :  { %166 = shalt.err (!%p163_p7)
}
  0xe9   :  { %112 = dma.vmem_to_hbm [thread:$0]  %s110_s1, 128, %s226_s3, [#allocation3]  }
  0xea   :  { %167 = dma.done.wait [#allocation3], 128  }
  0xeb   :  { %168 = vsyncadd [#allocation3], 4294967168 }
  0xec   :  { %116 = vsyncpa [#allocation3], 1 }

</bundles_post_ra>
